<compile_context>
chip_gen: v6e
topology: v6e:2x2x1
jax: 0.10.0
libtpu: 0.0.40
codegen_flags: <defaults>
</compile_context>

<pallas_src>
import jax
import jax.numpy as jnp
from jax.experimental import pallas as pl
from jax.experimental.pallas import tpu as pltpu

_TARGET_BLOCK_BYTES = 2 * 1024 * 1024  # per input, per pipeline buffer


def _vmem_limit_bytes() -> int:
    """Generation-aware scoped-VMEM limit (headroom on v7x's 64 MiB physical)."""
    try:
        cap = int(pltpu.get_tpu_info().vmem_capacity_bytes)
    except Exception:
        cap = 64 * 1024 * 1024  # conservative: assume the smallest (v7x)
    return min(int(cap * 0.7), 64 * 1024 * 1024)


def _make_partial_sse_kernel(nb: int, tile: int, valid_last: int, mask_axis: int):
    """Per-block partial sum of squared errors.

    Grid step b reads one tile of x and y, computes sum((x - y)^2) over the
    tile (masking the padded rows/lanes of the last, possibly ragged, block
    only) and broadcasts the scalar into its own (1, 8, 128) output block.
    """
    ragged = valid_last != tile

    def kernel(x_ref, y_ref, out_ref):
        b = pl.program_id(0)
        d = x_ref[...].astype(jnp.float32) - y_ref[...].astype(jnp.float32)
        sq = d * d

        def _write(v):
            s = jnp.sum(v, keepdims=True)                    # (1, 1) partial SSE
            out_ref[...] = jnp.broadcast_to(s, out_ref.shape)

        if ragged:
            @pl.when(b == nb - 1)
            def _last():
                idx = jax.lax.broadcasted_iota(jnp.int32, sq.shape, mask_axis)
                _write(jnp.where(idx < valid_last, sq, 0.0))

            @pl.when(b < nb - 1)
            def _body():
                _write(sq)
        else:
            _write(sq)

    return kernel


def reconstruction_metric(image: jax.Array, target: jax.Array) -> jax.Array:
    """MSE (mean over all elements) of image vs target, both [B, C, H, W].

    Matches torch.nn.MSELoss(reduction='mean'); always returns float32.
    bf16 inputs are supported (upcast to f32 inside the kernel) and halve HBM
    traffic for this bandwidth-bound reduction.
    """
    assert image.shape == target.shape, "image/target shape mismatch"
    n = int(image.size)
    assert n > 0

    itemsize = max(jnp.dtype(image.dtype).itemsize, jnp.dtype(target.dtype).itemsize)
    target_elems = max(8 * 128, _TARGET_BLOCK_BYTES // int(itemsize))

    # Contiguous, lane-dense 2D slab (free reshape: inputs are contiguous).
    lane = next((c for c in (1024, 512, 256, 128) if n % c == 0), None)

    if lane is not None:
        rows = n // lane
        x2, y2 = image.reshape(rows, lane), target.reshape(rows, lane)
        if n <= target_elems:
            # Single full-array block: one DMA, no grid-step overhead, no mask.
            block, nb, valid_last, mask_axis = (rows, lane), 1, rows, 0
            index_map = lambda b: (0, 0)
        else:
            tile_rows = max(8, (target_elems // lane) // 8 * 8)
            nb = int(pl.cdiv(rows, tile_rows))
            block = (tile_rows, lane)
            valid_last, mask_axis = rows - (nb - 1) * tile_rows, 0
            index_map = lambda b: (b, 0)
    else:
        # N not divisible by 128 (rare for images): lane-tile a single (1, N) row.
        x2, y2 = image.reshape(1, n), target.reshape(1, n)
        if n <= target_elems:
            block, nb, valid_last, mask_axis = (1, n), 1, n, 1
            index_map = lambda b: (0, 0)
        else:
            tile_cols = max(128, (target_elems // 128) * 128)
            nb = int(pl.cdiv(n, tile_cols))
            block = (1, tile_cols)
            valid_last, mask_axis = n - (nb - 1) * tile_cols, 1
            index_map = lambda b: (0, b)

    kernel = _make_partial_sse_kernel(nb, block[mask_axis], valid_last, mask_axis)

    partials = pl.pallas_call(
        kernel,
        out_shape=jax.ShapeDtypeStruct((nb, 8, 128), jnp.float32),
        grid=(nb,),
        in_specs=[
            pl.BlockSpec(block, index_map),
            pl.BlockSpec(block, index_map),
        ],
        out_specs=pl.BlockSpec((1, 8, 128), lambda b: (b, 0, 0)),
        compiler_params=pltpu.CompilerParams(
            dimension_semantics=("parallel",),
            vmem_limit_bytes=_vmem_limit_bytes(),
        ),
    )(x2, y2)

    # nb per-block partials (pairwise-summed by XLA) -> mean over all elements.
    return jnp.sum(partials[:, 0, 0]) / jnp.float32(n)


if __name__ == "__main__":
    key = jax.random.PRNGKey(0)

    def _ref(a, b):
        return jnp.mean((a.astype(jnp.float32) - b.astype(jnp.float32)) ** 2)

    k1, k2, k3, k4, k5, k6 = jax.random.split(key, 6)

    # 1) Small shape implied by the module: B=2, C=4, H=16, W=16 (single-block path).
    image = jax.random.normal(k1, (2, 4, 16, 16), dtype=jnp.float32)
    target = jax.random.normal(k2, (2, 4, 16, 16), dtype=jnp.float32)
    loss = reconstruction_metric(image, target)
    jax.block_until_ready(loss)
    assert bool(jnp.allclose(loss, _ref(image, target), atol=1e-5, rtol=1e-5)), loss

    # 2) Larger image -> multi-block row-tiled path with a ragged last block.
    big_i = jax.random.normal(k3, (2, 3, 360, 512), dtype=jnp.float32)
    big_t = jax.random.normal(k4, (2, 3, 360, 512), dtype=jnp.float32)
    big_loss = reconstruction_metric(big_i, big_t)
    jax.block_until_ready(big_loss)
    assert bool(jnp.allclose(big_loss, _ref(big_i, big_t), atol=1e-5, rtol=1e-5)), big_loss

    # 3) Element count not a multiple of 128 -> (1, N) fallback path.
    odd_i = jax.random.normal(k5, (1, 3, 17, 19), dtype=jnp.float32)
    odd_t = jax.random.normal(k6, (1, 3, 17, 19), dtype=jnp.float32)
    odd_loss = reconstruction_metric(odd_i, odd_t)
    jax.block_until_ready(odd_loss)
    assert bool(jnp.allclose(odd_loss, _ref(odd_i, odd_t), atol=1e-5, rtol=1e-5)), odd_loss

    # 4) bf16 inputs (half the HBM traffic; upcast to f32 inside the kernel).
    bf_i, bf_t = image.astype(jnp.bfloat16), target.astype(jnp.bfloat16)
    bf_loss = reconstruction_metric(bf_i, bf_t)
    jax.block_until_ready(bf_loss)
    assert bool(jnp.allclose(bf_loss, _ref(bf_i, bf_t), atol=1e-5, rtol=1e-5)), bf_loss

    print("KERNEL_OK")
</pallas_src>

<mosaic_0001>
module attributes {stable_mosaic.version = 11 : i64} {
  func.func @kernel(%arg0: i32, %arg1: memref<2x1024xf32, #tpu.memory_space<vmem>>, %arg2: memref<2x1024xf32, #tpu.memory_space<vmem>>, %arg3: memref<1x8x128xf32, #tpu.memory_space<vmem>>) attributes {dimension_semantics = [#tpu.dimension_semantics<parallel>], iteration_bounds = array<i64: 1>, scalar_prefetch = 0 : i64, scratch_operands = 0 : i64, tpu.core_type = #tpu.core_type<tc>, window_params = [{pipeline_mode = #tpu.pipeline_mode<synchronous>, transform_indices = @transform_0, window_bounds = array<i64: 2, 1024>}, {pipeline_mode = #tpu.pipeline_mode<synchronous>, transform_indices = @transform_1, window_bounds = array<i64: 2, 1024>}, {transform_indices = @transform_2, window_bounds = array<i64: 1, 8, 128>}]} {
    %c0 = arith.constant 0 : index
    %c0_0 = arith.constant 0 : index
    %0 = vector.load %arg1[%c0, %c0_0] : memref<2x1024xf32, #tpu.memory_space<vmem>>, vector<2x1024xf32>
    %c0_1 = arith.constant 0 : index
    %c0_2 = arith.constant 0 : index
    %1 = vector.load %arg2[%c0_1, %c0_2] : memref<2x1024xf32, #tpu.memory_space<vmem>>, vector<2x1024xf32>
    %2 = arith.subf %0, %1 : vector<2x1024xf32>
    %3 = arith.mulf %2, %2 : vector<2x1024xf32>
    %4 = vector.shape_cast %3 : vector<2x1024xf32> to vector<1x2x1024xf32>
    %cst = arith.constant dense<0.000000e+00> : vector<1xf32>
    %5 = vector.multi_reduction <add>, %4, %cst [1, 2] : vector<1x2x1024xf32> to vector<1xf32>
    %6 = vector.shape_cast %5 : vector<1xf32> to vector<1x1x1xf32>
    %7 = vector.extract %6[0, 0, 0] : f32 from vector<1x1x1xf32>
    %8 = vector.broadcast %7 : f32 to vector<1x1xf32>
    %9 = vector.shape_cast %8 : vector<1x1xf32> to vector<1x1x1xf32>
    %10 = vector.broadcast %9 : vector<1x1x1xf32> to vector<1x8x128xf32>
    %c0_3 = arith.constant 0 : index
    %c0_4 = arith.constant 0 : index
    %c0_5 = arith.constant 0 : index
    %11 = vector.load %arg3[%c0_3, %c0_4, %c0_5] : memref<1x8x128xf32, #tpu.memory_space<vmem>>, vector<1x8x128xf32>
    tpu.vector_store %arg3[%c0_3, %c0_4, %c0_5], %10 {strides = array<i32>} : memref<1x8x128xf32, #tpu.memory_space<vmem>>, vector<1x8x128xf32>,
    return
  }
  func.func @transform_0(%arg0: i32) -> (i32, i32) {
    %c0_i32 = arith.constant 0 : i32
    %c0_i32_0 = arith.constant 0 : i32
    %c0_i32_1 = arith.constant 0 : i32
    return %c0_i32, %c0_i32_0 : i32, i32
  }
  func.func @transform_1(%arg0: i32) -> (i32, i32) {
    %c0_i32 = arith.constant 0 : i32
    %c0_i32_0 = arith.constant 0 : i32
    %c0_i32_1 = arith.constant 0 : i32
    return %c0_i32, %c0_i32_0 : i32, i32
  }
  func.func @transform_2(%arg0: i32) -> (i32, i32, i32) {
    %c0_i32 = arith.constant 0 : i32
    %c0_i32_0 = arith.constant 0 : i32
    %c0_i32_1 = arith.constant 0 : i32
    return %arg0, %c0_i32, %c0_i32_0 : i32, i32, i32
  }
}

</mosaic_0001>

<bundles_post_ra>
// kernel: tpu_custom_call.1
= control target key start
LH: loop header
LB: loop body
LE: loop exit
PB: predicated region body
PF: predicated region fallthrough
CT: control target
= control target key end

     0   :  { %7 = vsyncpa [#allocation3], 0  ;;  %s239_s0 = inlined_call_operand.hbm [shape: f32[2,1024], index: 0, kind: input, shape index: {}]   ;;  %s240_s1 = inlined_call_operand.hbm [shape: f32[2,1024], index: 1, kind: input, shape index: {}]   ;;  %s241_s2 = inlined_call_operand.hbm [shape: f32[1,8,128], index: 2, kind: output, shape index: {}]  }
   0x1   :  { %8 = vsyncpa [#allocation6], 0 }
   0x2   :  { %9 = vsyncpa [#allocation4], 0  ;;  %s203_s9 = smov [#allocation2]   ;;  %s204_s11 = smov [#allocation5]  }
   0x3   :  { %s16_s10 = sshll.u32 %s203_s9, 4  ;;  %s26_s12 = sshll.u32 %s204_s11, 4  ;;  %s17_s10 = int_to_ptr.vmem [resolvable:$true] %s16_s10  ;;  %s27_s12 = int_to_ptr.vmem [resolvable:$true] %s26_s12 }
   0x4   :  { %s145_s13 = scalar_lea.vmem %s17_s10, 256  ;;  %p150_p1 = scmp.lt.s32.totalorder %s17_s10, %s17_s10 }
   0x5   :  { %p146_p0 = scmp.ne.s32.totalorder %s17_s10, %s145_s13  ;;  %p151_p2 = scmp.lt.s32.totalorder %s145_s13, %s145_s13 }
   0x7   :  { %p152_p3 = por %p151_p2, %p150_p1 }
   0x9   :  { %p153_p4 = pnand %p152_p3, %p146_p0 }
   0xb   :  { %156 = shalt.err (!%p153_p4)
}
   0xc   :  { %19 = dma.hbm_to_vmem [thread:$0]  %s239_s0, 256, %s17_s10, [#allocation3]  }
   0xd   :  { %s165_s16 = scalar_lea.vmem %s27_s12, 256  ;;  %p170_p6 = scmp.lt.s32.totalorder %s27_s12, %s27_s12 }
   0xe   :  { %p166_p5 = scmp.ne.s32.totalorder %s27_s12, %s165_s16  ;;  %p171_p7 = scmp.lt.s32.totalorder %s165_s16, %s165_s16 }
  0x10   :  { %p172_p8 = por %p171_p7, %p170_p6 }
  0x12   :  { %p173_p9 = pnand %p172_p8, %p166_p5 }
  0x14   :  { %176 = shalt.err (!%p173_p9)
}
  0x15   :  { %29 = dma.hbm_to_vmem [thread:$0]  %s240_s1, 256, %s27_s12, [#allocation6]  }
  0x16   :  { %197 = dma.done.wait [#allocation3], 256  }
  0x17   :  { %198 = vsyncadd [#allocation3], 4294967040 }
  0x18   :  { %199 = dma.done.wait [#allocation6], 256  }
  0x19   :  { %200 = vsyncadd [#allocation6], 4294967040  ;;  %v50_v0 = vlaneseq  ;;  %v205_v1 = vmov 1983009808   ;;  %v36_v5 = vld [vmem:[#allocation2] sm:$0xff]  ;;  %v37_v6 = vld [vmem:[#allocation2 + $0x8] sm:$0xff] }
  0x1a   :  { %v48_v2 = vunpack.c.l.s4 %v205_v1  ;;  %v38_v7 = vld [vmem:[#allocation5] sm:$0xff]  ;;  %v39_v8 = vld [vmem:[#allocation5 + $0x8] sm:$0xff]  ;;  %vm88_vm0 = vcmask 1041408   ;;  %s206_s0 = smov [#allocation7]  }
  0x1b   :  { %v51_v4 = vshrl.u32 %v50_v0, 7  ;;  %v40_v9 = vsub.f32 %v36_v5, %v38_v7  ;;  %v41_v11 = vsub.f32 %v37_v6, %v39_v8  ;;  %s121_s1 = sshll.u32 %s206_s0, 4  ;;  %s122_s1 = int_to_ptr.vmem [resolvable:$true] %s121_s1 }
  0x1c   :  { %v49_v3 = vunpack.c.0.s8 %v48_v2  ;;  %s177_s20 = scalar_lea.vmem %s122_s1, 128  ;;  %p182_p11 = scmp.lt.s32.totalorder %s122_s1, %s122_s1 }
  0x1d   :  { %v42_v12 = vmul.f32 %v40_v9, %v40_v9  ;;  %v43_v13 = vmul.f32 %v41_v11, %v41_v11  ;;  %p178_p10 = scmp.ne.s32.totalorder %s122_s1, %s177_s20  ;;  %p183_p12 = scmp.lt.s32.totalorder %s177_s20, %s177_s20 }
  0x1e   :  { %v52_v10 = vsub.s32 %v49_v3, %v51_v4 }
  0x1f   :  { %v46_v14 = vcombine.high %v42_v12, %v42_v12  ;;  %v63_v16 = vcombine.high %v43_v13, %v43_v13  ;;  %p184_p13 = por %p183_p12, %p182_p11 }
  0x20   :  { %v53_v15 = vrot.slane %v42_v12, %v52_v10  ;;  %v70_v19 = vrot.slane %v43_v13, %v52_v10 }
  0x21   :  { %v60_v17 = vrot.slane %v46_v14, %v52_v10  ;;  %v77_v25 = vrot.slane %v63_v16, %v52_v10  ;;  %p185_p0 = pnand %p184_p13, %p178_p10 }
  0x22   :  { %v61_v18 = vcombine.high %v53_v15, %v53_v15  ;;  %v89_v20 = vsel %vm88_vm0, %v53_v15, 0.0  ;;  %v78_v26 = vcombine.high %v70_v19, %v70_v19  ;;  %v96_v29 = vsel %vm88_vm0, %v70_v19, 0.0 }
  0x23   :  { %v62_v21 = vcombine.high %v60_v17, %v60_v17  ;;  %v92_v23 = vsel %vm88_vm0, %v60_v17, 0.0  ;;  %v79_v31 = vcombine.high %v77_v25, %v77_v25  ;;  %v100_v34 = vsel %vm88_vm0, %v77_v25, 0.0 }
  0x24   :  { %v90_v22 = vsel %vm88_vm0, %v61_v18, 0.0  ;;  %v98_v32 = vsel %vm88_vm0, %v78_v26, 0.0 }
  0x25   :  { %v91_v24 = vadd.f32 %v90_v22, %v89_v20  ;;  %v94_v27 = vsel %vm88_vm0, %v62_v21, 0.0  ;;  %v102_v36 = vsel %vm88_vm0, %v79_v31, 0.0 }
  0x27   :  { %v93_v28 = vadd.f32 %v92_v23, %v91_v24 }
  0x29   :  { %v95_v30 = vadd.f32 %v94_v27, %v93_v28 }
  0x2b   :  { %v97_v33 = vadd.f32 %v96_v29, %v95_v30 }
  0x2d   :  { %v99_v35 = vadd.f32 %v98_v32, %v97_v33 }
  0x2f   :  { %v101_v37 = vadd.f32 %v100_v34, %v99_v35 }
  0x31   :  { %v103_v38 = vadd.f32 %v102_v36, %v101_v37 }
  0x33   :  { %104 = vadd.xlane.f32.xlu0 %v103_v38 }
  0xbc   :  { %v105_v39 = vpop.xlane.xlu0 %104 }
  0xbd   :  { %v106_v40 = vrot.slane %v105_v39, 4 }
  0xbf   :  { %v107_v41 = vadd.f32 %v106_v40, %v105_v39 }
  0xc1   :  { %v108_v42 = vrot.slane %v107_v41, 2 }
  0xc3   :  { %v109_v43 = vadd.f32 %v108_v42, %v107_v41 }
  0xc5   :  { %v110_v44 = vrot.slane %v109_v43, 1 }
  0xc7   :  { %v111_v45 = vadd.f32 %v110_v44, %v109_v43 }
  0xc9   :  { %131 = vpush %v111_v45 }
  0xfa   :  { %s132_s19 = spop %131 }
  0xfb   :  { %v113_v46 = vstv %s132_s19 }
  0xfc   :  { %114 = vst [vmem:[#allocation7] sm:$0xff] %v113_v46 }
  0xfd   :  { %188 = shalt.err (!%p185_p0)
}
  0xfe   :  { %124 = dma.vmem_to_hbm [thread:$0]  %s122_s1, 128, %s241_s2, [#allocation4]  }
  0xff   :  { %201 = dma.done.wait [#allocation4], 128  }
 0x100   :  { %202 = vsyncadd [#allocation4], 4294967168 }
 0x101   :  { %128 = vsyncpa [#allocation3], 1 }
 0x102   :  { %129 = vsyncpa [#allocation6], 1 }
 0x103   :  { %130 = vsyncpa [#allocation4], 1 }

</bundles_post_ra>
